<compile_context>
chip_gen: v7x
topology: tpu7x:2x2x1
jax: 0.10.0
libtpu: 0.0.40
codegen_flags: <defaults>
</compile_context>

<pallas_src>
import functools

import jax
import jax.numpy as jnp
from jax.experimental import pallas as pl
from jax.experimental.pallas import tpu as pltpu


# ---------------------------------------------------------------------------
# Kernels
# ---------------------------------------------------------------------------

def _tall_kernel(p_ref, x_ref, o_ref, *, approx_recip):
    """Small-D path. x_ref: [D, TILE] (softmax axis on sublanes, rows on lanes).
    o_ref: [1, TILE] lane-dense output."""
    p = p_ref[0]
    x = x_ref[...].astype(jnp.float32)            # cast in VMEM; HBM read stays native dtype
    s = p * x
    m = jnp.max(s, axis=0, keepdims=True)         # [1, TILE] per-group max (sublane reduce)
    e = jnp.exp(s - m)                            # <= 1 everywhere; padded cols stay finite
    den = jnp.sum(e, axis=0, keepdims=True)       # [1, TILE]
    num = jnp.sum(e * x, axis=0, keepdims=True)   # [1, TILE]
    o_ref[...] = (num * pl.reciprocal(den, approx=approx_recip)).astype(o_ref.dtype)


def _wide_kernel(p_ref, x_ref, o_ref, *, approx_recip):
    """Large-D path. x_ref: [T, D] (rows on sublanes). o_ref: [1, T] lane-dense."""
    p = p_ref[0]
    x = x_ref[...].astype(jnp.float32)
    s = p * x
    m = jnp.max(s, axis=-1, keepdims=True)        # [T, 1]
    e = jnp.exp(s - m)
    den = jnp.sum(e, axis=-1, keepdims=True)      # [T, 1]
    num = jnp.sum(e * x, axis=-1, keepdims=True)  # [T, 1]
    y = num * pl.reciprocal(den, approx=approx_recip)      # [T, 1]
    # Small XLU transpose -> lane-dense [1, T] store (no masked vst.msk, no 128x
    # lane-padded output writeback).
    o_ref[...] = jnp.transpose(y).astype(o_ref.dtype)


# ---------------------------------------------------------------------------
# Sizing helpers
# ---------------------------------------------------------------------------

def _round_up(v: int, m: int) -> int:
    return ((v + m - 1) // m) * m


def _pick_vmem_limit_bytes() -> int:
    """Generation-aware scoped-VMEM limit (v5e/v6e 128 MiB, v7x 64 MiB physical)."""
    try:
        cap = int(pltpu.get_tpu_info().vmem_capacity_bytes)
    except Exception:
        cap = 64 * 1024 * 1024                    # conservative fallback (v7x per-TC)
    return int(min(cap * 3 // 4, 112 * 1024 * 1024))


def _choose_minor_tile(rows: int, d: int, elem_bytes: int, vmem_limit: int) -> int:
    """Tile (multiple of 128) along the rows axis.  The budget accounts for the
    double-buffered native-dtype input block plus ~4 full-tile f32 temporaries."""
    per_elem = 2 * elem_bytes + 16                # 2x input (double buffer) + 4x f32 temps
    budget_elems = max(1, (vmem_limit * 3 // 5) // per_elem)
    tile = max(128, (budget_elems // max(d, 1)) // 128 * 128)
    tile = min(tile, _round_up(rows, 128))
    # Keep >= 2 grid steps when possible so both v7x TensorCores get work.
    if rows > 128 and pl.cdiv(rows, tile) < 2:
        tile = _round_up(pl.cdiv(rows, 2), 128)
    return int(tile)


# ---------------------------------------------------------------------------
# Wrapper
# ---------------------------------------------------------------------------

_SMALL_INPUT_BYTES = 256 * 1024   # below this, kernel dispatch overhead dominates
_TALL_MAX_D = 64                  # softmax-axis size at/below which the transposed
                                  # (D-on-sublanes) layout wins over the padded row layout


def model_forward(p, x, *, force_pallas=False, approx_reciprocal=True):
    """p: shape-(1,) parameter; x: [..., D]. Returns sum(softmax(p*x, -1) * x, -1).

    Output dtype follows PyTorch promotion (f32 parameter) -> float32."""
    orig_shape = x.shape
    D = int(orig_shape[-1])
    rows = 1
    for dim in orig_shape[:-1]:
        rows *= int(dim)

    out_dtype = jnp.promote_types(x.dtype, jnp.float32)
    p_scalar = jnp.asarray(p, dtype=jnp.float32).reshape((1,))

    # Small-input fast path: XLA fusion beats a single-step pallas_call here.
    if not force_pallas and x.size * x.dtype.itemsize < _SMALL_INPUT_BYTES:
        xf = x.astype(out_dtype)
        scores = jax.nn.softmax(p_scalar[0] * xf, axis=-1)
        return jnp.sum(scores * xf, axis=-1)

    if rows == 0 or D == 0:
        return jnp.zeros(orig_shape[:-1], dtype=out_dtype)

    vmem_limit = _pick_vmem_limit_bytes()
    elem_bytes = x.dtype.itemsize
    x2d = x.reshape(rows, D)
    tile = _choose_minor_tile(rows, D, elem_bytes, vmem_limit)
    grid = (pl.cdiv(rows, tile),)

    if D <= _TALL_MAX_D:
        # "Tall" layout: softmax axis on sublanes, rows on 128 lanes.
        xk = x2d.T                                           # (D, rows), one-time relayout
        kernel = functools.partial(_tall_kernel, approx_recip=approx_reciprocal)
        x_spec = pl.BlockSpec((D, tile), lambda i: (0, i))
    else:
        # "Wide" layout: rows on sublanes, full softmax axis on lanes.
        # TODO(synk): rows with D too large for one VMEM block would need an
        # online-softmax reduction axis over D; not required for this module.
        xk = x2d
        kernel = functools.partial(_wide_kernel, approx_recip=approx_reciprocal)
        x_spec = pl.BlockSpec((tile, D), lambda i: (i, 0))

    out = pl.pallas_call(
        kernel,
        out_shape=jax.ShapeDtypeStruct((1, rows), out_dtype),
        grid=grid,
        in_specs=[
            pl.BlockSpec(memory_space=pltpu.MemorySpace.SMEM),   # p: (1,) scalar in SMEM
            x_spec,                                              # pipelined input tiles
        ],
        out_specs=pl.BlockSpec((1, tile), lambda i: (0, i)),     # lane-dense stores
        compiler_params=pltpu.CompilerParams(
            dimension_semantics=("parallel",),                   # shard tiles over v7x TCs
            vmem_limit_bytes=vmem_limit,
        ),
    )(p_scalar, xk)

    return out.reshape(orig_shape[:-1])


# ---------------------------------------------------------------------------
# Self-test
# ---------------------------------------------------------------------------

if __name__ == "__main__":
    key = jax.random.PRNGKey(0)
    k1, k2, k3 = jax.random.split(key, 3)

    def ref(pv, xv):
        xf = xv.astype(jnp.float32)
        return jnp.sum(jax.nn.softmax(pv[0] * xf, axis=-1) * xf, axis=-1)

    # Module's NCHW-style shape (softmax over W=16) -> small-D "tall" path.
    x = jax.random.normal(k1, (2, 4, 16, 16), dtype=jnp.float32)
    p = jnp.zeros((1,), dtype=jnp.float32)          # nn.Parameter(torch.zeros(1))

    # Exact-reciprocal variant matches the XLA reference tightly.
    y = jax.block_until_ready(
        model_forward(p, x, force_pallas=True, approx_reciprocal=False))
    assert y.shape == x.shape[:-1] and y.dtype == jnp.float32
    assert jnp.allclose(y, ref(p, x), atol=1e-5, rtol=1e-5), "mismatch (p=0, exact)"

    # Default approximate (EUP) reciprocal: looser tolerance by design.
    y_fast = jax.block_until_ready(model_forward(p, x, force_pallas=True))
    assert jnp.allclose(y_fast, ref(p, x), atol=1e-2, rtol=1e-2), "mismatch (approx recip)"

    # Non-trivial p + ragged row count (masked last tile on the tall path).
    p2 = jnp.full((1,), 0.7, dtype=jnp.float32)
    x2 = jax.random.normal(k2, (3, 5, 16), dtype=jnp.float32)
    y2 = jax.block_until_ready(
        model_forward(p2, x2, force_pallas=True, approx_reciprocal=False))
    assert y2.shape == x2.shape[:-1]
    assert jnp.allclose(y2, ref(p2, x2), atol=1e-4, rtol=1e-4), "mismatch (p=0.7)"

    # bf16 input: HBM read stays bf16, math + output are f32 (PyTorch promotion).
    x3 = x.astype(jnp.bfloat16)
    y3 = jax.block_until_ready(
        model_forward(p2, x3, force_pallas=True, approx_reciprocal=False))
    assert y3.dtype == jnp.float32
    assert jnp.allclose(y3, ref(p2, x3), atol=1e-4, rtol=1e-4), "mismatch (bf16)"

    # Large softmax axis -> "wide" path with lane-dense [1, T] stores.
    p4 = jnp.full((1,), 0.3, dtype=jnp.float32)
    x4 = jax.random.normal(k3, (2, 160, 256), dtype=jnp.float32)
    y4 = jax.block_until_ready(
        model_forward(p4, x4, force_pallas=True, approx_reciprocal=False))
    assert y4.shape == x4.shape[:-1]
    assert jnp.allclose(y4, ref(p4, x4), atol=1e-4, rtol=1e-4), "mismatch (wide path)"

    # Default call (no force_pallas): tiny input takes the XLA fast path.
    y5 = jax.block_until_ready(model_forward(p, x))
    assert jnp.allclose(y5, ref(p, x), atol=1e-5, rtol=1e-5), "mismatch (fast path)"

    print("KERNEL_OK")
</pallas_src>

<mosaic_0001>
module attributes {stable_mosaic.version = 11 : i64} {
  func.func @_tall_kernel(%arg0: i32, %arg1: memref<1xf32, #tpu.memory_space<smem>>, %arg2: memref<16x128xf32, #tpu.memory_space<vmem>>, %arg3: memref<1x128xf32, #tpu.memory_space<vmem>>) attributes {dimension_semantics = [#tpu.dimension_semantics<parallel>], iteration_bounds = array<i64: 1>, scalar_prefetch = 0 : i64, scratch_operands = 0 : i64, tpu.core_type = #tpu.core_type<tc>, window_params = [{transform_indices = @transform_0, window_bounds = array<i64: 1>}, {transform_indices = @transform_1, window_bounds = array<i64: 16, 128>}, {transform_indices = @transform_2, window_bounds = array<i64: 1, 128>}]} {
    %c0 = arith.constant 0 : index
    %0 = memref.load %arg1[%c0] : memref<1xf32, #tpu.memory_space<smem>>
    %c0_0 = arith.constant 0 : index
    %c0_1 = arith.constant 0 : index
    %1 = vector.load %arg2[%c0_0, %c0_1] : memref<16x128xf32, #tpu.memory_space<vmem>>, vector<16x128xf32>
    %2 = vector.broadcast %0 : f32 to vector<16x128xf32>
    %3 = arith.mulf %2, %1 : vector<16x128xf32>
    %cst = arith.constant dense<0xFF800000> : vector<128xf32>
    %4 = vector.multi_reduction <maximumf>, %3, %cst [0] : vector<16x128xf32> to vector<128xf32>
    %5 = vector.shape_cast %4 : vector<128xf32> to vector<1x128xf32>
    %6 = vector.broadcast %5 : vector<1x128xf32> to vector<16x128xf32>
    %7 = arith.subf %3, %6 : vector<16x128xf32>
    %8 = math.exp %7 : vector<16x128xf32>
    %cst_2 = arith.constant dense<0.000000e+00> : vector<128xf32>
    %9 = vector.multi_reduction <add>, %8, %cst_2 [0] : vector<16x128xf32> to vector<128xf32>
    %10 = vector.shape_cast %9 : vector<128xf32> to vector<1x128xf32>
    %11 = arith.mulf %8, %1 : vector<16x128xf32>
    %cst_3 = arith.constant dense<0.000000e+00> : vector<128xf32>
    %12 = vector.multi_reduction <add>, %11, %cst_3 [0] : vector<16x128xf32> to vector<128xf32>
    %13 = vector.shape_cast %12 : vector<128xf32> to vector<1x128xf32>
    %14 = tpu.reciprocal %10 : vector<1x128xf32> -> vector<1x128xf32>
    %15 = arith.mulf %13, %14 : vector<1x128xf32>
    %c0_4 = arith.constant 0 : index
    %c0_5 = arith.constant 0 : index
    %16 = vector.load %arg3[%c0_4, %c0_5] : memref<1x128xf32, #tpu.memory_space<vmem>>, vector<1x128xf32>
    tpu.vector_store %arg3[%c0_4, %c0_5], %15 {strides = array<i32>} : memref<1x128xf32, #tpu.memory_space<vmem>>, vector<1x128xf32>,
    return
  }
  func.func @transform_0(%arg0: i32) -> i32 {
    %c0_i32 = arith.constant 0 : i32
    %c0_i32_0 = arith.constant 0 : i32
    return %c0_i32 : i32
  }
  func.func @transform_1(%arg0: i32) -> (i32, i32) {
    %c0_i32 = arith.constant 0 : i32
    %c0_i32_0 = arith.constant 0 : i32
    return %c0_i32, %arg0 : i32, i32
  }
  func.func @transform_2(%arg0: i32) -> (i32, i32) {
    %c0_i32 = arith.constant 0 : i32
    %c0_i32_0 = arith.constant 0 : i32
    return %c0_i32, %arg0 : i32, i32
  }
}

</mosaic_0001>

<bundles_post_ra>
// kernel: tpu_custom_call.1
= control target key start
LH: loop header
LB: loop body
LE: loop exit
PB: predicated region body
PF: predicated region fallthrough
CT: control target
= control target key end

     0   :  { %8 = vsyncpa [#allocation4], 0  ;;  %s184_s0 = inlined_call_operand.<no memory space> [shape: f32[1], index: 0, kind: input, shape index: {}]   ;;  %s185_s1 = inlined_call_operand.hbm [shape: f32[16,128], index: 1, kind: input, shape index: {}]   ;;  %s186_s2 = inlined_call_operand.hbm [shape: f32[1,128], index: 2, kind: output, shape index: {}]  }
   0x1   :  { %9 = vsyncpa [#allocation5], 0  ;;  %s138_s9 = smov [#allocation3]   ;;  %s90_s13 = scalar_lea.hbm %s185_s1, 256 }
   0x2   :  { %s17_s10 = sshll.u32 %s138_s9, 4  ;;  %p91_p0 = scmp.ne.s32.totalorder %s185_s1, %s90_s13  ;;  %s18_s10 = int_to_ptr.vmem [resolvable:$true] %s17_s10 }
   0x3   :  { %p94_p1 = scmp.lt.u32.totalorder %s90_s13, %s185_s1 }
   0x5   :  { %p96_p2 = pnand %p94_p1, %p91_p0 }
   0x7   :  { %99 = shalt.err (!%p96_p2)
}
   0x8   :  { %s100_s18 = scalar_lea.vmem %s18_s10, 256  ;;  %p105_p4 = scmp.lt.s32.totalorder %s18_s10, %s18_s10 }
   0x9   :  { %p101_p3 = scmp.ne.s32.totalorder %s18_s10, %s100_s18  ;;  %p106_p5 = scmp.lt.s32.totalorder %s100_s18, %s100_s18 }
   0xb   :  { %p107_p6 = por %p106_p5, %p105_p4 }
   0xd   :  { %p108_p7 = pnand %p107_p6, %p101_p3 }
   0xf   :  { %111 = shalt.err (!%p108_p7)
}
  0x10   :  { %s139_s19 = smov 128   ;;  %s140_s20 = smov 8  }
  0x11   :  { %23 = dma.hbm_to_vmem [thread:$0]  %s185_s1, 256, %s18_s10, [#allocation4], %s139_s19, %s139_s19, %s140_s20  }
  0x12   :  { %134 = dma.done.wait [#allocation4], 256  }
  0x13   :  { %135 = vsyncadd [#allocation4], 4294967040  ;;  %v30_v0 = vstv %s184_s0  ;;  %v28_v1 = vld [vmem:[#allocation3] sm:$0xff]  ;;  %v29_v2 = vld [vmem:[#allocation3 + $0x8] sm:$0xff]  ;;  %s141_s0 = smov [#allocation6]  }
  0x14   :  { %v31_v3 = vmul.f32 %v30_v0, %v28_v1  ;;  %v32_v4 = vmul.f32 %v30_v0, %v29_v2  ;;  %s71_s1 = sshll.u32 %s141_s0, 4  ;;  %s72_s1 = int_to_ptr.vmem [resolvable:$true] %s71_s1 }
  0x15   :  { %s112_s25 = scalar_lea.vmem %s72_s1, 16  ;;  %s116_s26 = scalar_lea.vmem %s72_s1, 32 }
  0x16   :  { %v33_v5 = vmax.f32 %v31_v3, %v32_v4  ;;  %p113_p8 = scmp.ne.s32.totalorder %s72_s1, %s112_s25  ;;  %p117_p9 = scmp.lt.s32.totalorder %s72_s1, %s72_s1 }
  0x17   :  { %p118_p10 = scmp.lt.s32.totalorder %s116_s26, %s112_s25 }
  0x18   :  { %v34_v6 = vrot.slane %v33_v5, 4 }
  0x19   :  { %p119_p11 = por %p118_p10, %p117_p9 }
  0x1a   :  { %v35_v7 = vmax.f32 %v33_v5, %v34_v6 }
  0x1b   :  { %p120_p12 = pnand %p119_p11, %p113_p8 }
  0x1c   :  { %v36_v8 = vrot.slane %v35_v7, 2 }
  0x1e   :  { %v37_v9 = vmax.f32 %v35_v7, %v36_v8 }
  0x20   :  { %v38_v10 = vrot.slane %v37_v9, 1 }
  0x22   :  { %v39_v11 = vmax.f32 %v37_v9, %v38_v10 }
  0x24   :  { %v40_v12 = vsub.f32 %v31_v3, %v39_v11  ;;  %v41_v13 = vsub.f32 %v32_v4, %v39_v11 }
  0x26   :  { %v42_v14 = vmul.f32 1.442695, %v40_v12  ;;  %v44_v15 = vmul.f32 1.442695, %v41_v13 }
  0x28   :  { %84 = vpow2.f32 %v42_v14 }
  0x29   :  { %86 = vpow2.f32 %v44_v15 }
  0x32   :  { %v85_v16 = vpop.eup %84 }
  0x33   :  { %v87_v17 = vpop.eup %86  ;;  %v53_v18 = vmul.f32 %v85_v16, %v28_v1 }
  0x34   :  { %v46_v19 = vadd.f32 %v87_v17, %v85_v16  ;;  %v54_v20 = vmul.f32 %v87_v17, %v29_v2 }
  0x36   :  { %v47_v21 = vrot.slane %v46_v19, 4  ;;  %v55_v22 = vadd.f32 %v54_v20, %v53_v18 }
  0x38   :  { %v48_v23 = vadd.f32 %v47_v21, %v46_v19  ;;  %v56_v24 = vrot.slane %v55_v22, 4 }
  0x3a   :  { %v49_v25 = vrot.slane %v48_v23, 2  ;;  %v57_v26 = vadd.f32 %v56_v24, %v55_v22 }
  0x3c   :  { %v50_v27 = vadd.f32 %v49_v25, %v48_v23  ;;  %v58_v28 = vrot.slane %v57_v26, 2 }
  0x3e   :  { %v51_v29 = vrot.slane %v50_v27, 1  ;;  %v59_v31 = vadd.f32 %v58_v28, %v57_v26 }
  0x40   :  { %v52_v30 = vadd.f32 %v51_v29, %v50_v27  ;;  %v60_v32 = vrot.slane %v59_v31, 1 }
  0x42   :  { %88 = vrcp.f32 %v52_v30  ;;  %v61_v33 = vadd.f32 %v60_v32, %v59_v31 }
  0x4c   :  { %v89_v34 = vpop.eup %88 }
  0x4d   :  { %v63_v35 = vmul.f32 %v89_v34, %v61_v33 }
  0x4f   :  { %64 = vst [vmem:[#allocation6] sm:$0x1] %v63_v35 }
  0x50   :  { %123 = shalt.err (!%p120_p12)
}
  0x51   :  { %s124_s29 = scalar_lea.hbm %s186_s2, 16 }
  0x52   :  { %p125_p13 = scmp.ne.s32.totalorder %s186_s2, %s124_s29  ;;  %p128_p0 = scmp.lt.u32.totalorder %s124_s29, %s186_s2 }
  0x54   :  { %p130_p1 = pnand %p128_p0, %p125_p13 }
  0x56   :  { %133 = shalt.err (!%p130_p1)
}
  0x57   :  { %74 = dma.vmem_to_hbm [thread:$0]  %s72_s1, 16, %s186_s2, [#allocation5]  }
  0x58   :  { %136 = dma.done.wait [#allocation5], 16  }
  0x59   :  { %137 = vsyncadd [#allocation5], 4294967280 }
  0x5a   :  { %78 = vsyncpa [#allocation4], 1 }
  0x5b   :  { %79 = vsyncpa [#allocation5], 1 }

</bundles_post_ra>
